<compile_context>
chip_gen: v5e
topology: v5e:2x2
jax: 0.10.0
libtpu: 0.0.40
codegen_flags: <defaults>
</compile_context>

<pallas_src>
import functools

import jax
import jax.numpy as jnp
from jax.experimental import pallas as pl
from jax.experimental.pallas import tpu as pltpu

NHIDDEN = 128
BN_EPS = 1e-5


# ----------------------------------------------------------------------------
# Device-aware knobs
# ----------------------------------------------------------------------------
def _device_kind():
    try:
        return jax.devices()[0].device_kind.lower()
    except Exception:
        return ""


def _use_bf16_compute():
    # bf16 VPU/EUP exists on v6e/v7x; v5e (and older) gain nothing from bf16 math.
    kind = _device_kind()
    return ("v6" in kind) or ("v7" in kind)


def _vmem_limit_bytes():
    kind = _device_kind()
    if "v7" in kind:
        return 32 * 1024 * 1024       # v7x: 64 MiB physical per core -> stay at half
    return 64 * 1024 * 1024           # v5e / v6e: 128 MiB physical, raise scoped limit


def _choose_r_chunk(r):
    # Block last dim must be a multiple of 128 or the full axis, so chunking only
    # activates for large, 128-divisible R (exactly when it matters for vreg pressure).
    for rc in (512, 256, 128):
        if r > rc and r % rc == 0:
            return rc
    return r


def _estimate_rbf_vmem_bytes(c_out, rc, tt):
    c8 = max(c_out, 8)                     # sublane padding
    rc_pad = max(rc, 128)                  # lane padding of the (C, rc) blocks
    io = 2 * 2 * c8 * tt * 4               # mask + timestamp blocks, double buffered
    out = 2 * c8 * tt * 4                  # output block, double buffered
    acc = 2 * c8 * tt * 4                  # num / norm accumulators
    per_r = 2 * 2 * c8 * rc_pad * 4        # feat + scaled-grid blocks, double buffered
    inter = 3 * c8 * rc * tt * 4           # diff / exp / weighted intermediates (f32 bound)
    return io + out + acc + per_r + inter


def _choose_time_tile(t, c_out, rc, budget):
    for tt in (1024, 512, 256, 128):
        if t >= tt and t % tt == 0 and _estimate_rbf_vmem_bytes(c_out, rc, tt) <= budget:
            return tt
    return t                                # small / indivisible T: take the full axis


# ----------------------------------------------------------------------------
# Stage 1: CompressFC per batch element (grid = (B,)), transposed form so no
# (0,2,1) permutes are needed.  BN is pre-folded into w1/b1.
#   x_ref   (1, C_in, R)   w1t_ref (H, C_in)   b1_ref (H, 1)
#   w2t_ref (C_out, H)     b2_ref (C_out, 1)   feat_ref (1, C_out, R)
# ----------------------------------------------------------------------------
def _compress_fc_kernel(x_ref, w1t_ref, b1_ref, w2t_ref, b2_ref, feat_ref):
    x = x_ref[0]                                                   # (C_in, R)
    h = jnp.dot(w1t_ref[...], x, preferred_element_type=jnp.float32) + b1_ref[...]
    h = jnp.maximum(h, 0.0)                                        # ReLU (Dropout = id)
    feat_ref[0] = (jnp.dot(w2t_ref[...], h, preferred_element_type=jnp.float32)
                   + b2_ref[...]).astype(feat_ref.dtype)           # (C_out, R)


# ----------------------------------------------------------------------------
# Stage 2: masked Gaussian-RBF interpolation.
# Grid = (B, T_tiles, R_chunks), semantics ("parallel", "parallel", "arbitrary").
#   feat_ref (1, C_out, rc)      m_ref/rt_ref (1, 1, C_out, TT)
#   st_ref   (C_out, rc)  = sqrt(beta) * interp_t chunk
#   sb_ref   (C_out, 1)   = sqrt(beta)
#   o_ref    (1, C_out, TT)
#   num_acc / norm_acc : VMEM (C_out, TT) f32 accumulators over R chunks
# ----------------------------------------------------------------------------
def _rbf_kernel(feat_ref, m_ref, rt_ref, st_ref, sb_ref, o_ref,
                num_acc, norm_acc, *, compute_dtype):
    ri = pl.program_id(2)

    @pl.when(ri == 0)
    def _():
        num_acc[...] = jnp.zeros_like(num_acc)
        norm_acc[...] = jnp.zeros_like(norm_acc)

    rt = rt_ref[0, 0]                                  # (C, TT) f32
    s_rt = sb_ref[...] * rt                            # sqrt(beta) * timestamps, f32
    st = st_ref[...]                                   # (C, rc) f32
    f = feat_ref[0].astype(compute_dtype)              # (C, rc)

    # diff in f32 (large scaled coordinates would cancel badly in bf16); only the exp
    # argument / weights drop to compute_dtype (bf16 on v6e/v7x -> 2x EUP throughput).
    diff = st[:, :, None] - s_rt[:, None, :]           # (C, rc, TT) f32
    w = jnp.exp((-(diff * diff)).astype(compute_dtype))  # gaussian basis, compute_dtype

    norm_acc[...] += jnp.sum(w.astype(jnp.float32), axis=1)
    num_acc[...] += jnp.sum((w * f[:, :, None]).astype(jnp.float32), axis=1)

    @pl.when(ri == pl.num_programs(2) - 1)
    def _():
        m = m_ref[0, 0]                                # (C, TT)
        inv = pl.reciprocal(norm_acc[...] + 1e-10, approx=True)
        # Mask hoisted out of the R-sum: identical to the reference for {0,1} masks.
        o_ref[0] = (m * num_acc[...] * inv).astype(o_ref.dtype)


# ----------------------------------------------------------------------------
# Full RBF.forward
# ----------------------------------------------------------------------------
@functools.partial(jax.jit, static_argnames=("out_dim",))
def rbf_forward(interp_data, raw_input, params, *, out_dim):
    b, c_in, r = interp_data.shape
    t = raw_input.shape[2]

    # Fold BatchNorm1d (eval mode) into the first linear layer.
    s = params["bn_gamma"] / jnp.sqrt(params["bn_var"] + BN_EPS)
    w1t = (params["w1"] * s[None, :]).T                            # (H, C_in)
    b1_eff = params["b1"] * s + params["bn_beta"] - params["bn_mean"] * s
    w2t = params["w2"].T                                           # (C_out, H)

    pos_kernel = jax.nn.softplus(params["kernel"])                 # stable softplus
    sqrt_beta = jnp.sqrt(pos_kernel)                               # (C_out,)
    s_t = sqrt_beta[:, None] * params["interp_t"][None, :]         # (C_out, R)

    # ---- stage 1: compressed features feat (B, C_out, R) --------------------
    feat = pl.pallas_call(
        _compress_fc_kernel,
        out_shape=jax.ShapeDtypeStruct((b, out_dim, r), jnp.float32),
        grid=(b,),
        in_specs=[
            pl.BlockSpec((1, c_in, r), lambda i: (i, 0, 0)),       # interp_data
            pl.BlockSpec((NHIDDEN, c_in), lambda i: (0, 0)),       # (BN-folded w1)^T
            pl.BlockSpec((NHIDDEN, 1), lambda i: (0, 0)),          # folded bias
            pl.BlockSpec((out_dim, NHIDDEN), lambda i: (0, 0)),    # w2^T
            pl.BlockSpec((out_dim, 1), lambda i: (0, 0)),          # b2
        ],
        out_specs=pl.BlockSpec((1, out_dim, r), lambda i: (i, 0, 0)),
        compiler_params=pltpu.CompilerParams(dimension_semantics=("parallel",)),
    )(interp_data, w1t, b1_eff.reshape(-1, 1), w2t, params["b2"].reshape(-1, 1))

    # ---- stage 2: RBF interpolation -----------------------------------------
    # Free metadata reshape: channel groups become an explicit axis so the mask /
    # timestamp groups are selected by the BlockSpec index_map (no HBM copies).
    raw4 = raw_input.reshape(b, 4, out_dim, t)

    rc = _choose_r_chunk(r)
    vmem_limit = _vmem_limit_bytes()
    tt = _choose_time_tile(t, out_dim, rc, vmem_limit // 3)
    grid = (b, t // tt, r // rc)

    compute_dtype = jnp.bfloat16 if _use_bf16_compute() else jnp.float32

    cost = pl.CostEstimate(
        flops=6 * b * out_dim * r * t,
        transcendentals=b * out_dim * r * t,
        bytes_accessed=4 * (3 * b * out_dim * t + b * out_dim * r
                            + out_dim * r + out_dim),
    )

    kernel = functools.partial(_rbf_kernel, compute_dtype=compute_dtype)

    return pl.pallas_call(
        kernel,
        out_shape=jax.ShapeDtypeStruct((b, out_dim, t), interp_data.dtype),
        grid=grid,
        in_specs=[
            pl.BlockSpec((1, out_dim, rc), lambda i, j, k: (i, 0, k)),        # feat
            pl.BlockSpec((1, 1, out_dim, tt), lambda i, j, k: (i, 1, 0, j)),  # mask group
            pl.BlockSpec((1, 1, out_dim, tt), lambda i, j, k: (i, 2, 0, j)),  # timestamps
            pl.BlockSpec((out_dim, rc), lambda i, j, k: (0, k)),              # sqrt(beta)*interp_t
            pl.BlockSpec((out_dim, 1), lambda i, j, k: (0, 0)),               # sqrt(beta)
        ],
        out_specs=pl.BlockSpec((1, out_dim, tt), lambda i, j, k: (i, 0, j)),
        scratch_shapes=[pltpu.VMEM((out_dim, tt), jnp.float32),               # num acc
                        pltpu.VMEM((out_dim, tt), jnp.float32)],              # norm acc
        compiler_params=pltpu.CompilerParams(
            dimension_semantics=("parallel", "parallel", "arbitrary"),
            vmem_limit_bytes=vmem_limit),
        cost_estimate=cost,
    )(feat, raw4, raw4, s_t, sqrt_beta.reshape(-1, 1))


# ----------------------------------------------------------------------------
# Pure-JAX reference (mirrors the PyTorch forward) for correctness checks.
# ----------------------------------------------------------------------------
def rbf_forward_ref(interp_data, raw_input, params, *, out_dim):
    b, c_in, r = interp_data.shape
    x = jnp.transpose(interp_data, (0, 2, 1)).reshape(b * r, c_in)
    h = x @ params["w1"] + params["b1"]
    h = (h - params["bn_mean"]) / jnp.sqrt(params["bn_var"] + BN_EPS)
    h = h * params["bn_gamma"] + params["bn_beta"]
    h = jnp.maximum(h, 0.0)
    f = h @ params["w2"] + params["b2"]
    feat = jnp.transpose(f.reshape(b, r, out_dim), (0, 2, 1))

    m = raw_input[:, out_dim:2 * out_dim, :]
    rt = raw_input[:, 2 * out_dim:3 * out_dim, :]
    pos_kernel = jax.nn.softplus(params["kernel"])
    d = jnp.abs(rt[:, :, :, None] - params["interp_t"][None, None, None, :])
    beta = pos_kernel[None, :, None, None]
    rbf = jnp.exp(-beta * d * d) * m[:, :, :, None]
    norm = rbf.sum(-1)
    num = (rbf * feat[:, :, None, :]).sum(-1)
    return num / (norm + 1e-10) * m


if __name__ == "__main__":
    # Small, module-consistent shapes.
    b, c_in, out_dim = 2, 8, 4
    ref_points, t_out = 16, 16
    hours_look_ahead = 24.0

    key = jax.random.PRNGKey(0)
    keys = jax.random.split(key, 10)

    params = {
        "w1": 0.1 * jax.random.normal(keys[0], (c_in, NHIDDEN), jnp.float32),
        "b1": 0.05 * jax.random.normal(keys[1], (NHIDDEN,), jnp.float32),
        "bn_gamma": jnp.ones((NHIDDEN,), jnp.float32),
        "bn_beta": jnp.zeros((NHIDDEN,), jnp.float32),
        "bn_mean": jnp.zeros((NHIDDEN,), jnp.float32),
        "bn_var": jnp.ones((NHIDDEN,), jnp.float32),
        "w2": 0.1 * jax.random.normal(keys[2], (NHIDDEN, out_dim), jnp.float32),
        "b2": 0.05 * jax.random.normal(keys[3], (out_dim,), jnp.float32),
        "kernel": jax.random.uniform(keys[4], (out_dim,), jnp.float32),       # torch.rand
        "interp_t": jnp.linspace(0.0, hours_look_ahead, ref_points, dtype=jnp.float32),
    }

    interp_data = jax.random.normal(keys[5], (b, c_in, ref_points), jnp.float32)

    values = jax.random.normal(keys[6], (b, out_dim, t_out), jnp.float32)
    mask = (jax.random.uniform(keys[7], (b, out_dim, t_out)) > 0.3).astype(jnp.float32)
    timestamps = hours_look_ahead * jax.random.uniform(keys[8], (b, out_dim, t_out),
                                                       jnp.float32)
    holdout = jnp.ones((b, out_dim, t_out), jnp.float32)
    raw_input = jnp.concatenate([values, mask, timestamps, holdout], axis=1)

    out = rbf_forward(interp_data, raw_input, params, out_dim=out_dim)
    out = jax.block_until_ready(out)

    ref = rbf_forward_ref(interp_data, raw_input, params, out_dim=out_dim)
    assert out.shape == (b, out_dim, t_out)
    # bf16 exp path (v6e/v7x) needs a looser tolerance; f32 path (v5e) stays tight.
    tol = 2e-2 if _use_bf16_compute() else 2e-3
    assert jnp.allclose(out, ref, rtol=tol, atol=tol), (
        f"max abs diff {jnp.max(jnp.abs(out - ref))}")

    print("KERNEL_OK")
</pallas_src>

<mosaic_0001>
module attributes {stable_mosaic.version = 11 : i64} {
  func.func @_compress_fc_kernel(%arg0: i32, %arg1: memref<1x8x16xf32, #tpu.memory_space<vmem>>, %arg2: memref<128x8xf32, #tpu.memory_space<vmem>>, %arg3: memref<128x1xf32, #tpu.memory_space<vmem>>, %arg4: memref<4x128xf32, #tpu.memory_space<vmem>>, %arg5: memref<4x1xf32, #tpu.memory_space<vmem>>, %arg6: memref<1x4x16xf32, #tpu.memory_space<vmem>>) attributes {dimension_semantics = [#tpu.dimension_semantics<parallel>], iteration_bounds = array<i64: 2>, scalar_prefetch = 0 : i64, scratch_operands = 0 : i64, tpu.core_type = #tpu.core_type<tc>, window_params = [{transform_indices = @transform_0, window_bounds = array<i64: 1, 8, 16>}, {pipeline_mode = #tpu.pipeline_mode<synchronous>, transform_indices = @transform_1, window_bounds = array<i64: 128, 8>}, {pipeline_mode = #tpu.pipeline_mode<synchronous>, transform_indices = @transform_2, window_bounds = array<i64: 128, 1>}, {pipeline_mode = #tpu.pipeline_mode<synchronous>, transform_indices = @transform_3, window_bounds = array<i64: 4, 128>}, {pipeline_mode = #tpu.pipeline_mode<synchronous>, transform_indices = @transform_4, window_bounds = array<i64: 4, 1>}, {transform_indices = @transform_5, window_bounds = array<i64: 1, 4, 16>}]} {
    %c0 = arith.constant 0 : index
    %c0_0 = arith.constant 0 : index
    %c0_1 = arith.constant 0 : index
    %0 = vector.load %arg1[%c0, %c0_0, %c0_1] : memref<1x8x16xf32, #tpu.memory_space<vmem>>, vector<1x8x16xf32>
    %1 = vector.shape_cast %0 : vector<1x8x16xf32> to vector<8x16xf32>
    %c0_2 = arith.constant 0 : index
    %c0_3 = arith.constant 0 : index
    %2 = vector.load %arg2[%c0_2, %c0_3] : memref<128x8xf32, #tpu.memory_space<vmem>>, vector<128x8xf32>
    %cst = arith.constant dense<0.000000e+00> : vector<128x16xf32>
    %3 = tpu.matmul %2, %1, %cst {dimension_numbers = #tpu.dot_dimension_numbers<[1], [0], [0], [1], [0, 0, 1, 1], [], []>} : vector<128x8xf32>, vector<8x16xf32>, vector<128x16xf32> -> vector<128x16xf32>
    %c0_4 = arith.constant 0 : index
    %c0_5 = arith.constant 0 : index
    %4 = vector.load %arg3[%c0_4, %c0_5] : memref<128x1xf32, #tpu.memory_space<vmem>>, vector<128x1xf32>
    %5 = vector.broadcast %4 : vector<128x1xf32> to vector<128x16xf32>
    %6 = arith.addf %3, %5 : vector<128x16xf32>
    %cst_6 = arith.constant 0.000000e+00 : f32
    %7 = vector.broadcast %cst_6 : f32 to vector<128x16xf32>
    %8 = arith.maximumf %6, %7 : vector<128x16xf32>
    %c0_7 = arith.constant 0 : index
    %c0_8 = arith.constant 0 : index
    %9 = vector.load %arg4[%c0_7, %c0_8] : memref<4x128xf32, #tpu.memory_space<vmem>>, vector<4x128xf32>
    %cst_9 = arith.constant dense<0.000000e+00> : vector<4x16xf32>
    %10 = tpu.matmul %9, %8, %cst_9 {dimension_numbers = #tpu.dot_dimension_numbers<[1], [0], [0], [1], [0, 0, 1, 1], [], []>} : vector<4x128xf32>, vector<128x16xf32>, vector<4x16xf32> -> vector<4x16xf32>
    %c0_10 = arith.constant 0 : index
    %c0_11 = arith.constant 0 : index
    %11 = vector.load %arg5[%c0_10, %c0_11] : memref<4x1xf32, #tpu.memory_space<vmem>>, vector<4x1xf32>
    %12 = vector.broadcast %11 : vector<4x1xf32> to vector<4x16xf32>
    %13 = arith.addf %10, %12 : vector<4x16xf32>
    %c0_12 = arith.constant 0 : index
    %c0_13 = arith.constant 0 : index
    %c0_14 = arith.constant 0 : index
    %14 = vector.load %arg6[%c0_12, %c0_13, %c0_14] : memref<1x4x16xf32, #tpu.memory_space<vmem>>, vector<1x4x16xf32>
    %15 = vector.shape_cast %14 : vector<1x4x16xf32> to vector<4x16xf32>
    %16 = vector.shape_cast %13 : vector<4x16xf32> to vector<1x4x16xf32>
    tpu.vector_store %arg6[%c0_12, %c0_13, %c0_14], %16 {strides = array<i32>} : memref<1x4x16xf32, #tpu.memory_space<vmem>>, vector<1x4x16xf32>,
    return
  }
  func.func @transform_0(%arg0: i32) -> (i32, i32, i32) {
    %c0_i32 = arith.constant 0 : i32
    %c0_i32_0 = arith.constant 0 : i32
    %c0_i32_1 = arith.constant 0 : i32
    return %arg0, %c0_i32, %c0_i32_0 : i32, i32, i32
  }
  func.func @transform_1(%arg0: i32) -> (i32, i32) {
    %c0_i32 = arith.constant 0 : i32
    %c0_i32_0 = arith.constant 0 : i32
    %c0_i32_1 = arith.constant 0 : i32
    return %c0_i32, %c0_i32_0 : i32, i32
  }
  func.func @transform_2(%arg0: i32) -> (i32, i32) {
    %c0_i32 = arith.constant 0 : i32
    %c0_i32_0 = arith.constant 0 : i32
    %c0_i32_1 = arith.constant 0 : i32
    return %c0_i32, %c0_i32_0 : i32, i32
  }
  func.func @transform_3(%arg0: i32) -> (i32, i32) {
    %c0_i32 = arith.constant 0 : i32
    %c0_i32_0 = arith.constant 0 : i32
    %c0_i32_1 = arith.constant 0 : i32
    return %c0_i32, %c0_i32_0 : i32, i32
  }
  func.func @transform_4(%arg0: i32) -> (i32, i32) {
    %c0_i32 = arith.constant 0 : i32
    %c0_i32_0 = arith.constant 0 : i32
    %c0_i32_1 = arith.constant 0 : i32
    return %c0_i32, %c0_i32_0 : i32, i32
  }
  func.func @transform_5(%arg0: i32) -> (i32, i32, i32) {
    %c0_i32 = arith.constant 0 : i32
    %c0_i32_0 = arith.constant 0 : i32
    %c0_i32_1 = arith.constant 0 : i32
    return %arg0, %c0_i32, %c0_i32_0 : i32, i32, i32
  }
}

module attributes {stable_mosaic.version = 11 : i64} {
  func.func @_rbf_kernel(%arg0: i32, %arg1: i32, %arg2: i32, %arg3: memref<1x4x16xf32, #tpu.memory_space<vmem>>, %arg4: memref<1x1x4x16xf32, #tpu.memory_space<vmem>>, %arg5: memref<1x1x4x16xf32, #tpu.memory_space<vmem>>, %arg6: memref<4x16xf32, #tpu.memory_space<vmem>>, %arg7: memref<4x1xf32, #tpu.memory_space<vmem>>, %arg8: memref<1x4x16xf32, #tpu.memory_space<vmem>>, %arg9: memref<4x16xf32, #tpu.memory_space<vmem>>, %arg10: memref<4x16xf32, #tpu.memory_space<vmem>>) attributes {dimension_semantics = [#tpu.dimension_semantics<parallel>, #tpu.dimension_semantics<parallel>, #tpu.dimension_semantics<arbitrary>], iteration_bounds = array<i64: 2, 1, 1>, scalar_prefetch = 0 : i64, scratch_operands = 2 : i64, tpu.core_type = #tpu.core_type<tc>, window_params = [{transform_indices = @transform_0, window_bounds = array<i64: 1, 4, 16>}, {transform_indices = @transform_1, window_bounds = array<i64: 1, 1, 4, 16>}, {transform_indices = @transform_2, window_bounds = array<i64: 1, 1, 4, 16>}, {transform_indices = @transform_3, window_bounds = array<i64: 4, 16>}, {pipeline_mode = #tpu.pipeline_mode<synchronous>, transform_indices = @transform_4, window_bounds = array<i64: 4, 1>}, {transform_indices = @transform_5, window_bounds = array<i64: 1, 4, 16>}]} {
    %c0_i32 = arith.constant 0 : i32
    %0 = arith.cmpi eq, %arg2, %c0_i32 : i32
    %1 = arith.extui %0 : i1 to i32
    %c0_i32_0 = arith.constant 0 : i32
    %2 = arith.cmpi ne, %1, %c0_i32_0 : i32
    scf.if %2 {
      %cst_23 = arith.constant 0.000000e+00 : f32
      %34 = vector.broadcast %cst_23 : f32 to vector<4x16xf32>
      %c0_24 = arith.constant 0 : index
      %c0_25 = arith.constant 0 : index
      %35 = vector.load %arg9[%c0_24, %c0_25] : memref<4x16xf32, #tpu.memory_space<vmem>>, vector<4x16xf32>
      tpu.vector_store %arg9[%c0_24, %c0_25], %34 {strides = array<i32>} : memref<4x16xf32, #tpu.memory_space<vmem>>, vector<4x16xf32>,
      %cst_26 = arith.constant 0.000000e+00 : f32
      %36 = vector.broadcast %cst_26 : f32 to vector<4x16xf32>
      %c0_27 = arith.constant 0 : index
      %c0_28 = arith.constant 0 : index
      %37 = vector.load %arg10[%c0_27, %c0_28] : memref<4x16xf32, #tpu.memory_space<vmem>>, vector<4x16xf32>
      tpu.vector_store %arg10[%c0_27, %c0_28], %36 {strides = array<i32>} : memref<4x16xf32, #tpu.memory_space<vmem>>, vector<4x16xf32>,
    } else {
    }
    %c0 = arith.constant 0 : index
    %c0_1 = arith.constant 0 : index
    %c0_2 = arith.constant 0 : index
    %c0_3 = arith.constant 0 : index
    %3 = vector.load %arg5[%c0, %c0_1, %c0_2, %c0_3] : memref<1x1x4x16xf32, #tpu.memory_space<vmem>>, vector<1x1x4x16xf32>
    %4 = vector.shape_cast %3 : vector<1x1x4x16xf32> to vector<4x16xf32>
    %c0_4 = arith.constant 0 : index
    %c0_5 = arith.constant 0 : index
    %5 = vector.load %arg7[%c0_4, %c0_5] : memref<4x1xf32, #tpu.memory_space<vmem>>, vector<4x1xf32>
    %6 = vector.broadcast %5 : vector<4x1xf32> to vector<4x16xf32>
    %7 = arith.mulf %6, %4 : vector<4x16xf32>
    %c0_6 = arith.constant 0 : index
    %c0_7 = arith.constant 0 : index
    %8 = vector.load %arg6[%c0_6, %c0_7] : memref<4x16xf32, #tpu.memory_space<vmem>>, vector<4x16xf32>
    %c0_8 = arith.constant 0 : index
    %c0_9 = arith.constant 0 : index
    %c0_10 = arith.constant 0 : index
    %9 = vector.load %arg3[%c0_8, %c0_9, %c0_10] : memref<1x4x16xf32, #tpu.memory_space<vmem>>, vector<1x4x16xf32>
    %10 = vector.shape_cast %9 : vector<1x4x16xf32> to vector<4x16xf32>
    %11 = vector.shape_cast %8 : vector<4x16xf32> to vector<4x16x1xf32>
    %12 = vector.shape_cast %7 : vector<4x16xf32> to vector<4x1x16xf32>
    %13 = vector.broadcast %11 : vector<4x16x1xf32> to vector<4x16x16xf32>
    %14 = vector.broadcast %12 : vector<4x1x16xf32> to vector<4x16x16xf32>
    %15 = arith.subf %13, %14 : vector<4x16x16xf32>
    %16 = arith.mulf %15, %15 : vector<4x16x16xf32>
    %cst = arith.constant 0.000000e+00 : f32
    %17 = vector.broadcast %cst : f32 to vector<4x16x16xf32>
    %18 = arith.subf %17, %16 : vector<4x16x16xf32>
    %19 = math.exp %18 : vector<4x16x16xf32>
    %c0_11 = arith.constant 0 : index
    %c0_12 = arith.constant 0 : index
    %20 = vector.load %arg10[%c0_11, %c0_12] : memref<4x16xf32, #tpu.memory_space<vmem>>, vector<4x16xf32>
    %cst_13 = arith.constant dense<0.000000e+00> : vector<4x16xf32>
    %21 = vector.multi_reduction <add>, %19, %cst_13 [1] : vector<4x16x16xf32> to vector<4x16xf32>
    %22 = arith.addf %20, %21 : vector<4x16xf32>
    %c0_14 = arith.constant 0 : index
    %c0_15 = arith.constant 0 : index
    %23 = vector.load %arg10[%c0_14, %c0_15] : memref<4x16xf32, #tpu.memory_space<vmem>>, vector<4x16xf32>
    tpu.vector_store %arg10[%c0_14, %c0_15], %22 {strides = array<i32>} : memref<4x16xf32, #tpu.memory_space<vmem>>, vector<4x16xf32>,
    %c0_16 = arith.constant 0 : index
    %c0_17 = arith.constant 0 : index
    %24 = vector.load %arg9[%c0_16, %c0_17] : memref<4x16xf32, #tpu.memory_space<vmem>>, vector<4x16xf32>
    %25 = vector.shape_cast %10 : vector<4x16xf32> to vector<4x16x1xf32>
    %26 = vector.broadcast %25 : vector<4x16x1xf32> to vector<4x16x16xf32>
    %27 = arith.mulf %19, %26 : vector<4x16x16xf32>
    %cst_18 = arith.constant dense<0.000000e+00> : vector<4x16xf32>
    %28 = vector.multi_reduction <add>, %27, %cst_18 [1] : vector<4x16x16xf32> to vector<4x16xf32>
    %29 = arith.addf %24, %28 : vector<4x16xf32>
    %c0_19 = arith.constant 0 : index
    %c0_20 = arith.constant 0 : index
    %30 = vector.load %arg9[%c0_19, %c0_20] : memref<4x16xf32, #tpu.memory_space<vmem>>, vector<4x16xf32>
    tpu.vector_store %arg9[%c0_19, %c0_20], %29 {strides = array<i32>} : memref<4x16xf32, #tpu.memory_space<vmem>>, vector<4x16xf32>,
    %c0_i32_21 = arith.constant 0 : i32
    %31 = arith.cmpi eq, %arg2, %c0_i32_21 : i32
    %32 = arith.extui %31 : i1 to i32
    %c0_i32_22 = arith.constant 0 : i32
    %33 = arith.cmpi ne, %32, %c0_i32_22 : i32
    scf.if %33 {
      %c0_23 = arith.constant 0 : index
      %c0_24 = arith.constant 0 : index
      %c0_25 = arith.constant 0 : index
      %c0_26 = arith.constant 0 : index
      %34 = vector.load %arg4[%c0_23, %c0_24, %c0_25, %c0_26] : memref<1x1x4x16xf32, #tpu.memory_space<vmem>>, vector<1x1x4x16xf32>
      %35 = vector.shape_cast %34 : vector<1x1x4x16xf32> to vector<4x16xf32>
      %c0_27 = arith.constant 0 : index
      %c0_28 = arith.constant 0 : index
      %36 = vector.load %arg10[%c0_27, %c0_28] : memref<4x16xf32, #tpu.memory_space<vmem>>, vector<4x16xf32>
      %cst_29 = arith.constant 1.000000e-10 : f32
      %37 = vector.broadcast %cst_29 : f32 to vector<4x16xf32>
      %38 = arith.addf %36, %37 : vector<4x16xf32>
      %39 = tpu.reciprocal %38 {approx = true} : vector<4x16xf32> -> vector<4x16xf32>
      %c0_30 = arith.constant 0 : index
      %c0_31 = arith.constant 0 : index
      %40 = vector.load %arg9[%c0_30, %c0_31] : memref<4x16xf32, #tpu.memory_space<vmem>>, vector<4x16xf32>
      %41 = arith.mulf %35, %40 : vector<4x16xf32>
      %42 = arith.mulf %41, %39 : vector<4x16xf32>
      %c0_32 = arith.constant 0 : index
      %c0_33 = arith.constant 0 : index
      %c0_34 = arith.constant 0 : index
      %43 = vector.load %arg8[%c0_32, %c0_33, %c0_34] : memref<1x4x16xf32, #tpu.memory_space<vmem>>, vector<1x4x16xf32>
      %44 = vector.shape_cast %43 : vector<1x4x16xf32> to vector<4x16xf32>
      %45 = vector.shape_cast %42 : vector<4x16xf32> to vector<1x4x16xf32>
      tpu.vector_store %arg8[%c0_32, %c0_33, %c0_34], %45 {strides = array<i32>} : memref<1x4x16xf32, #tpu.memory_space<vmem>>, vector<1x4x16xf32>,
    } else {
    }
    return
  }
  func.func @transform_0(%arg0: i32, %arg1: i32, %arg2: i32) -> (i32, i32, i32) {
    %c0_i32 = arith.constant 0 : i32
    %c0_i32_0 = arith.constant 0 : i32
    return %arg0, %c0_i32, %arg2 : i32, i32, i32
  }
  func.func @transform_1(%arg0: i32, %arg1: i32, %arg2: i32) -> (i32, i32, i32, i32) {
    %c1_i32 = arith.constant 1 : i32
    %c0_i32 = arith.constant 0 : i32
    %c0_i32_0 = arith.constant 0 : i32
    return %arg0, %c1_i32, %c0_i32, %arg1 : i32, i32, i32, i32
  }
  func.func @transform_2(%arg0: i32, %arg1: i32, %arg2: i32) -> (i32, i32, i32, i32) {
    %c2_i32 = arith.constant 2 : i32
    %c0_i32 = arith.constant 0 : i32
    %c0_i32_0 = arith.constant 0 : i32
    return %arg0, %c2_i32, %c0_i32, %arg1 : i32, i32, i32, i32
  }
  func.func @transform_3(%arg0: i32, %arg1: i32, %arg2: i32) -> (i32, i32) {
    %c0_i32 = arith.constant 0 : i32
    %c0_i32_0 = arith.constant 0 : i32
    return %c0_i32, %arg2 : i32, i32
  }
  func.func @transform_4(%arg0: i32, %arg1: i32, %arg2: i32) -> (i32, i32) {
    %c0_i32 = arith.constant 0 : i32
    %c0_i32_0 = arith.constant 0 : i32
    %c0_i32_1 = arith.constant 0 : i32
    return %c0_i32, %c0_i32_0 : i32, i32
  }
  func.func @transform_5(%arg0: i32, %arg1: i32, %arg2: i32) -> (i32, i32, i32) {
    %c0_i32 = arith.constant 0 : i32
    %c0_i32_0 = arith.constant 0 : i32
    return %arg0, %c0_i32, %arg1 : i32, i32, i32
  }
}

</mosaic_0001>

<bundles_post_ra>
// kernel: rbf_forward.3
= control target key start
LH: loop header
LB: loop body
LE: loop exit
PB: predicated region body
PF: predicated region fallthrough
CT: control target
= control target key end

     0   :  { %10 = vsyncpa [#allocation5], 0  ;;  %s1157_s0 = inlined_call_operand.vmem [shape: f32[2,4,16], index: 0, kind: input, shape index: {}]   ;;  %s1158_s1 = inlined_call_operand.vmem [shape: f32[2,4,4,16], index: 1, kind: input, shape index: {}, may-alias: {1,2}]   ;;  %s1159_s2 = inlined_call_operand.vmem [shape: f32[2,4,4,16], index: 2, kind: input, shape index: {}, may-alias: {1,2}]   ;;  %s1160_s3 = inlined_call_operand.vmem [shape: f32[4,16], index: 3, kind: input, shape index: {}]   ;;  %s1161_s4 = inlined_call_operand.vmem [shape: f32[4,1], index: 4, kind: input, shape index: {}]   ;;  %s1162_s5 = inlined_call_operand.hbm [shape: f32[2,4,16], index: 5, kind: output, shape index: {}]  }
   0x1   :  { %12 = vsyncpa [#allocation5 + $0x1], 0  ;;  %s997_s18 = smov 0   ;;  %s999_s19 = smov 0  }
   0x2   :  { %s1001_s20 = smov 0   ;;  %s1003_s21 = smov 0  }
   0x3   :  { %s1005_s22 = smov 0   ;;  %s1007_s23 = smov 0  }
   0x4 LB: > { %s776_s24 = sadd.s32 4294967295, %s963_s23   ;;  %s777_s25 = sadd.s32 4294967294, %s963_s23   ;;  %s963_s23 = sphi %s1007_s23, %s18_s23   ;;  %s959_s22 = sphi %s1005_s22, %s1169_s22   ;;  %s955_s21 = sphi %s1003_s21, %s1168_s21   ;;  %s951_s20 = sphi %s1001_s20, %s1167_s20   ;;  %s947_s19 = sphi %s999_s19, %s1166_s19   ;;  %s943_s18 = sphi %s997_s18, %s1165_s18  }
   0x5   : > { %s37_s26 = sadd.s32 1, %s959_s22  ;;  %s177_s27 = sadd.s32 1, %s951_s20 }
   0x6   : > { %p39_p0 = scmp.ge.s32.totalorder %s37_s26, 2  ;;  %p187_p1 = scmp.ne.s32.totalorder %s951_s20, %s947_s19 }
   0x7   : > { %p188_p2 = scmp.eq.s32.totalorder %s776_s24, 1  ;;  %p193_p3 = scmp.ne.s32.totalorder %s947_s19, %s943_s18 }
   0x8   : > { %s1171_s26 = smov (%p39_p0, %s37_s26), 0  ;;  %p194_p5 = scmp.eq.s32.totalorder %s777_s25, 1 }
   0x9   : > { %p1037_p4 = por %p188_p2, %p187_p1  ;;  %s172_s29 = ssub.s32 %s959_s22, %s1171_s26 }
   0xa   : > { %p781_p6 = scmp.ge.s32.totalorder %s963_s23, 1  ;;  %p175_p7 = scmp.eq.s32.totalorder %s172_s29, 0 }
   0xb   : > { %p1044_p8 = por %p194_p5, %p193_p3  ;;  %p256_p9 = scmp.lt.s32.totalorder %s963_s23, 3 }
   0xc   : > { %s1050_s6 = scalar_select %p175_p7, %s951_s20, %s177_s27  }
   0xd   : > { %p257_p10 = pnand %p781_p6, %p256_p9 }
   0xe   : > { %p308_p11 = scmp.lt.s32.totalorder (!%p257_p10), %s955_s21, 1  ;;  %s305_s27 = sand.u32 (!%p257_p10), 1, %s947_s19  }
   0xf   : > { %260 = sbr.rel (%p257_p10) target bundleno = 254 (0xfe), region = 40  ;;  %s782_s29 = sshll.u32 (!%p257_p10), %s305_s27, 2 }
  0x10   : > { %s791_s7 = sshll.u32 (!%p257_p10), %s955_s21, 2 }
  0x11   : > { %s640_s14 = scalar_lea.hbm (!%p257_p10), %s1162_s5, %s791_s7 }
  0x12   : > { %s644_s24 = sshll.u32 (!%p257_p10), %s640_s14, 4  ;;  %s645_s24 = int_to_ptr.hbm [resolvable:$true] %s644_s24 }
  0x14   : > { %v345_v0 = vld [vmem:[%s1161_s4] sm:$0xf]  ;;  %v355_v1 = vlaneseq  ;;  %v965_v2 = vmov 0   ;;  %s1060_s11 = scalar_select %p308_p11, %s955_s21, 1  ;;  %vm341_vm0 = vcmask 125952   ;;  %v966_v50 = vmov 0.0  }
  0x15   : > { %853 = vset.pattern.permute.xlu0 %v965_v2  ;;  %v352_v4 = vld [vmem:[%s1160_s3] sm:$0xf]  ;;  %342 = vst.msk [vmem:[#allocation2] sm:$0xf] %vm341_vm0, %v966_v50  ;;  %vm459_vm1 = vcmask 130048   ;;  %vm500_vm2 = vcmask 1041409  }
  0x16   : > { %348 = vperm.xlu0 %853, %v345_v0   ;;  %v356_v3 = vshrl.u32 %v355_v1, 7  ;;  %v380_v5 = vperm.slane %v352_v4, 2  ;;  %v367_v6 = vperm.slane %v352_v4, 1  ;;  %v354_v7 = vperm.slane %v352_v4, 0  ;;  %s783_s12 = sshll.u32 %s1060_s11, 2  ;;  %s794_s16 = sshll.u32 %s1060_s11, 4 }
  0x17   : > { %v393_v9 = vperm.slane %v352_v4, 3  ;;  %s314_s15 = scalar_lea.vmem %s1157_s0, %s783_s12  ;;  %s710_s25 = scalar_lea.vmem %s1159_s2, %s794_s16  ;;  %343 = vst.msk [vmem:[#allocation3] sm:$0xf] %vm341_vm0, %v966_v50  ;;  %vm502_vm3 = vcmask 1042434   ;;  %vm504_vm4 = vcmask 1043459  }
  0x18   : > { %856 = vset.pattern.permute.xlu2 %v356_v3  ;;  %855 = vset.pattern.permute.xlu1 %v356_v3  ;;  %v363_v8 = vadd.s32 8, %v356_v3  ;;  %v353_v10 = vld [vmem:[%s314_s15] sm:$0xf]  ;;  %v788_v16 = vld [vmem:[%s710_s25 + $0x8] sm:$0xf]  ;;  %s705_s10 = scalar_lea.vmem %s1158_s1, %s794_s16  ;;  %s307_s15 = scalar_lea.vmem [#allocation4], %s782_s29 }
  0x19   : > { %v537_v11 = vperm.slane %v353_v10, 2  ;;  %v511_v12 = vperm.slane %v353_v10, 0  ;;  %v524_v13 = vperm.slane %v353_v10, 1  ;;  %v550_v14 = vperm.slane %v353_v10, 3  ;;  %s642_s17 = sshll.u32 %s307_s15, 4  ;;  %s629_s21 = scalar_lea.sflag [#allocation5], %s305_s27  ;;  %s643_s17 = int_to_ptr.vmem [resolvable:$true] %s642_s17 }
  0x1a   : > { %s899_s11 = sshra.s32 %s645_s24, 4  ;;  %s905_s29 = scalar_lea.hbm %s1162_s5, 8  ;;  %s900_s11 = int_to_ptr.hbm [resolvable:$true] %s899_s11 }
  0x1b   : > { %s901_s16 = scalar_lea.hbm %s900_s11, 4  ;;  %p906_p1 = scmp.lt.s32.totalorder %s900_s11, %s1162_s5 }
  0x1c   : > { %p902_p12 = scmp.ne.s32.totalorder %s900_s11, %s901_s16  ;;  %p907_p2 = scmp.lt.s32.totalorder %s905_s29, %s901_s16 }
  0x1e   : > { %854 = vset.pattern.permute.xlu0 %v356_v3  ;;  %p903_p13 = pnand %p902_p12, %p1037_p4  ;;  %p908_p3 = por %p907_p2, %p906_p1 }
  0x20   : > { %385 = vperm.xlu2 %856, %v380_v5   ;;  %372 = vperm.xlu1 %855, %v367_v6   ;;  %p904_p0 = pneg %p903_p13 }
  0x22   : > { %p909_p5 = pnand %p908_p3, %p904_p0 }
  0x26   : > { %359 = vperm.xlu0 %854, %v354_v7  }
  0x28   : > { %858 = vset.pattern.permute.xlu2 %v363_v8  ;;  %857 = vset.pattern.permute.xlu1 %v363_v8 }
  0x2e   : > { %860 = vset.pattern.permute.xlu0 %v363_v8 }
  0x30   : > { %378 = vperm.xlu2 %858, %v367_v6   ;;  %365 = vperm.xlu1 %857, %v354_v7  }
  0x36   : > { %404 = vperm.xlu0 %860, %v393_v9  }
  0x38   : > { %859 = vset.pattern.permute.xlu2 %v356_v3  ;;  %391 = vperm.xlu1 %857, %v380_v5  }
  0x3e   : > { %863 = vset.pattern.permute.xlu0 %v356_v3 }
  0x40   : > { %398 = vperm.xlu2 %859, %v393_v9   ;;  %861 = vset.pattern.permute.xlu1 %v356_v3 }
  0x46   : > { %542 = vperm.xlu0 %863, %v537_v11  }
  0x48   : > { %862 = vset.pattern.permute.xlu2 %v363_v8  ;;  %516 = vperm.xlu1 %861, %v511_v12  }
  0x4e   : > { %866 = vset.pattern.permute.xlu0 %v363_v8 }
  0x50   : > { %522 = vperm.xlu2 %862, %v511_v12   ;;  %529 = vperm.xlu1 %861, %v524_v13  }
  0x58   : > { %535 = vperm.xlu2 %862, %v524_v13   ;;  %864 = vset.pattern.permute.xlu1 %v363_v8 }
  0x60   : > { %865 = vset.pattern.permute.xlu2 %v356_v3  ;;  %548 = vperm.xlu1 %864, %v537_v11  }
  0x68   : > { %555 = vperm.xlu2 %865, %v550_v14   ;;  %561 = vperm.xlu1 %864, %v550_v14  }
  0x7a   : > { %v386_v15 = vpop.permute.xlu2 %385 }
  0x88   : > { %v349_v17 = vpop.permute.xlu0 %348 }
  0x89   : > { %v351_v18 = vmul.f32 %v788_v16, %v349_v17 }
  0x8a   : > { %v379_v21 = vpop.permute.xlu2 %378 }
  0x8b   : > { %v407_v19 = vrot.slane %v351_v18, 1  ;;  %v410_v26 = vperm.slane %v351_v18, 0  ;;  %v409_v27 = vrot.slane %v351_v18, 3  ;;  %v408_v30 = vrot.slane %v351_v18, 2 }
  0x8d   : > { %v411_v20 = vperm.slane %v407_v19, 0  ;;  %v413_v33 = vperm.slane %v409_v27, 0  ;;  %v412_v37 = vperm.slane %v408_v30, 0 }
  0x8f   : > { %v421_v22 = vsub.f32 %v379_v21, %v411_v20  ;;  %v422_v42 = vsub.f32 %v386_v15, %v412_v37 }
  0x91   : > { %v429_v25 = vmul.f32 %v421_v22, %v421_v22  ;;  %v430_v47 = vmul.f32 %v422_v42, %v422_v42 }
  0x92   : > { %v373_v23 = vpop.permute.xlu1 %372 }
  0x93   : > { %v420_v24 = vsub.f32 %v373_v23, %v411_v20  ;;  %v437_v31 = vsub.f32 0.0, %v429_v25  ;;  %v438_v55 = vsub.f32 0.0, %v430_v47 }
  0x95   : > { %v428_v28 = vmul.f32 %v420_v24, %v420_v24  ;;  %v448_v38 = vmul.f32 1.442695, %v437_v31  ;;  %v450_v0 = vmul.f32 1.442695, %v438_v55 }
  0x97   : > { %v436_v34 = vsub.f32 0.0, %v428_v28  ;;  %867 = vpow2.f32 %v448_v38 }
  0x98   : > { %v360_v29 = vpop.permute.xlu0 %359 }
  0x99   : > { %v418_v32 = vsub.f32 %v360_v29, %v410_v26  ;;  %v446_v40 = vmul.f32 1.442695, %v436_v34 }
  0x9a   : > { %v399_v36 = vpop.permute.xlu2 %398 }
  0x9b   : > { %v426_v35 = vmul.f32 %v418_v32, %v418_v32  ;;  %v424_v39 = vsub.f32 %v399_v36, %v413_v33  ;;  %869 = vpow2.f32 %v446_v40 }
  0x9d   : > { %v434_v41 = vsub.f32 0.0, %v426_v35  ;;  %v432_v43 = vmul.f32 %v424_v39, %v424_v39  ;;  %v1074_v51 = vpop.eup %867 }
  0x9e   : > { %v470_v59 = vsel %vm459_vm1, %v1074_v51, 0.0 }
  0x9f   : > { %v442_v45 = vmul.f32 1.442695, %v434_v41  ;;  %v440_v48 = vsub.f32 0.0, %v432_v43 }
  0xa1   : > { %871 = vpow2.f32 %v442_v45  ;;  %v1076_v53 = vpop.eup %869  ;;  %v454_v56 = vmul.f32 1.442695, %v440_v48 }
  0xa2   : > { %v366_v44 = vpop.permute.xlu1 %365  ;;  %v469_v61 = vsel %vm459_vm1, %v1076_v53, 0.0 }
  0xa3   : > { %v419_v46 = vsub.f32 %v366_v44, %v410_v26  ;;  %v471_v4 = vadd.f32 %v470_v59, %v469_v61 }
  0xa5   : > { %v427_v49 = vmul.f32 %v419_v46, %v419_v46  ;;  %v472_v10 = vrot.slane %v471_v4, 4 }
  0xa7   : > { %v435_v52 = vsub.f32 0.0, %v427_v49  ;;  %v872_v1 = vpop.eup %871  ;;  %v473_v16 = vadd.f32 %v472_v10, %v471_v4 }
  0xa8   : > { %v405_v54 = vpop.permute.xlu0 %404  ;;  %v460_v7 = vsel %vm459_vm1, %v872_v1, 0.0 }
  0xa9   : > { %v444_v57 = vmul.f32 1.442695, %v435_v52  ;;  %v425_v58 = vsub.f32 %v405_v54, %v413_v33  ;;  %v474_v24 = vrot.slane %v473_v16, 2  ;;  %v458_v54 = vld [vmem:[#allocation3] sm:$0xf] }
  0xaa   : > { %v392_v60 = vpop.permute.xlu1 %391  ;;  %v523_v31 = vpop.permute.xlu2 %522 }
  0xab   : > { %873 = vpow2.f32 %v444_v57  ;;  %v433_v62 = vmul.f32 %v425_v58, %v425_v58  ;;  %v423_v63 = vsub.f32 %v392_v60, %v412_v37  ;;  %v475_v34 = vadd.f32 %v474_v24, %v473_v16 }
  0xac   : > { %875 = vpow2.f32 %v454_v56 }
  0xad   : > { %v441_v2 = vsub.f32 0.0, %v433_v62  ;;  %v431_v3 = vmul.f32 %v423_v63, %v423_v63  ;;  %877 = vpow2.f32 %v450_v0  ;;  %v476_v40 = vrot.slane %v475_v34, 1 }
  0xaf   : > { %v456_v5 = vmul.f32 1.442695, %v441_v2  ;;  %v439_v6 = vsub.f32 0.0, %v431_v3  ;;  %v477_v46 = vadd.f32 %v476_v40, %v475_v34  ;;  %v510_v40 = vld [vmem:[#allocation2] sm:$0xf] }
  0xb1   : > { %v874_v8 = vpop.eup %873  ;;  %879 = vpow2.f32 %v456_v5  ;;  %v452_v9 = vmul.f32 1.442695, %v439_v6 }
  0xb2   : > { %v461_v11 = vsel %vm459_vm1, %v874_v8, 0.0  ;;  %v1084_v12 = vpop.eup %875  ;;  %v536_v47 = vpop.permute.xlu2 %535  ;;  %v564_v59 = vmul.f32 %v874_v8, %v523_v31 }
  0xb3   : > { %v462_v13 = vadd.f32 %v461_v11, %v460_v7  ;;  %881 = vpow2.f32 %v452_v9  ;;  %v878_v15 = vpop.eup %877  ;;  %v487_v17 = vsel %vm459_vm1, %v1084_v12, 0.0  ;;  %v566_v55 = vmul.f32 %v1074_v51, %v536_v47 }
  0xb4   : > { %v478_v25 = vsel %vm459_vm1, %v878_v15, 0.0  ;;  %v572_v2 = vsel %vm459_vm1, %v564_v59, 0.0 }
  0xb5   : > { %v463_v14 = vrot.slane %v462_v13, 4  ;;  %v581_v62 = vsel %vm459_vm1, %v566_v55, 0.0 }
  0xb7   : > { %v1088_v18 = vpop.eup %879  ;;  %v464_v19 = vadd.f32 %v463_v14, %v462_v13 }
  0xb8   : > { %v488_v20 = vsel %vm459_vm1, %v1088_v18, 0.0  ;;  %v543_v63 = vpop.permute.xlu0 %542 }
  0xb9   : > { %v882_v21 = vpop.eup %881  ;;  %v465_v22 = vrot.slane %v464_v19, 2  ;;  %v489_v23 = vadd.f32 %v488_v20, %v487_v17 }
  0xba   : > { %v479_v26 = vsel %vm459_vm1, %v882_v21, 0.0  ;;  %v517_v27 = vpop.permute.xlu1 %516 }
  0xbb   : > { %v490_v28 = vrot.slane %v489_v23, 4  ;;  %v480_v29 = vadd.f32 %v479_v26, %v478_v25  ;;  %v466_v30 = vadd.f32 %v465_v22, %v464_v19  ;;  %v563_v56 = vmul.f32 %v872_v1, %v517_v27 }
  0xbc   : > { %v567_v1 = vmul.f32 %v878_v15, %v543_v63 }
  0xbd   : > { %v491_v32 = vadd.f32 %v490_v28, %v489_v23  ;;  %v481_v33 = vrot.slane %v480_v29, 4  ;;  %v467_v37 = vrot.slane %v466_v30, 1 }
  0xbe   : > { %v589_v7 = vsel %vm459_vm1, %v567_v1, 0.0 }
  0xbf   : > { %v492_v35 = vrot.slane %v491_v32, 2  ;;  %v482_v36 = vadd.f32 %v481_v33, %v480_v29  ;;  %v468_v42 = vadd.f32 %v467_v37, %v466_v30 }
  0xc1   : > { %v493_v38 = vadd.f32 %v492_v35, %v491_v32  ;;  %v483_v39 = vrot.slane %v482_v36, 2  ;;  %v501_v52 = vsel %vm500_vm2, %v477_v46, %v468_v42  ;;  %v789_v46 = vld [vmem:[%s705_s10 + $0x4] sm:$0xf] }
  0xc2   : > { %v530_v44 = vpop.permute.xlu1 %529  ;;  %v556_v9 = vpop.permute.xlu2 %555 }
  0xc3   : > { %v484_v41 = vadd.f32 %v483_v39, %v482_v36  ;;  %v494_v43 = vrot.slane %v493_v38, 1  ;;  %v565_v49 = vmul.f32 %v1076_v53, %v530_v44  ;;  %v571_v53 = vsel %vm459_vm1, %v563_v56, 0.0 }
  0xc4   : > { %v573_v51 = vadd.f32 %v572_v2, %v571_v53  ;;  %v569_v16 = vmul.f32 %v1084_v12, %v556_v9 }
  0xc5   : > { %v485_v45 = vrot.slane %v484_v41, 1  ;;  %v495_v50 = vadd.f32 %v494_v43, %v493_v38  ;;  %v580_v60 = vsel %vm459_vm1, %v565_v49, 0.0 }
  0xc6   : > { %v582_v0 = vadd.f32 %v581_v62, %v580_v60  ;;  %v574_v6 = vrot.slane %v573_v51, 4 }
  0xc7   : > { %v486_v48 = vadd.f32 %v485_v45, %v484_v41 }
  0xc8   : > { %v583_v3 = vrot.slane %v582_v0, 4  ;;  %v575_v13 = vadd.f32 %v574_v6, %v573_v51 }
  0xc9   : > { %v503_v57 = vsel %vm502_vm3, %v486_v48, %v501_v52 }
  0xca   : > { %v505_v58 = vsel %vm504_vm4, %v495_v50, %v503_v57  ;;  %v584_v10 = vadd.f32 %v583_v3, %v582_v0  ;;  %v576_v22 = vrot.slane %v575_v13, 2 }
  0xcb   : > { %v507_v61 = vadd.f32 %v505_v58, %v458_v54 }
  0xcc   : > { %v585_v17 = vrot.slane %v584_v10, 2  ;;  %v577_v28 = vadd.f32 %v576_v22, %v575_v13 }
  0xcd   : > { %509 = vst.msk [vmem:[#allocation3] sm:$0xf] %vm341_vm0, %v507_v61 }
  0xce   : > { %v586_v25 = vadd.f32 %v585_v17, %v584_v10  ;;  %v578_v32 = vrot.slane %v577_v28, 1 }
  0xd0   : > { %v587_v30 = vrot.slane %v586_v25, 1  ;;  %v579_v36 = vadd.f32 %v578_v32, %v577_v28 }
  0xd2   : > { %v549_v4 = vpop.permute.xlu1 %548  ;;  %v588_v34 = vadd.f32 %v587_v30, %v586_v25 }
  0xd3   : > { %v568_v5 = vmul.f32 %v882_v21, %v549_v4  ;;  %v598_v21 = vsel %vm459_vm1, %v569_v16, 0.0 }
  0xd4   : > { %v611_v38 = vsel %vm500_vm2, %v588_v34, %v579_v36  ;;  %v621_v42 = vld [vmem:[#allocation3] sm:$0xf] }
  0xd5   : > { %v590_v8 = vsel %vm459_vm1, %v568_v5, 0.0  ;;  %v622_v45 = vadd.f32 1e-10, %v621_v42 }
  0xd6   : > { %v591_v11 = vadd.f32 %v590_v8, %v589_v7 }
  0xd7   : > { %883 = vrcp.f32 %v622_v45 }
  0xd8   : > { %v592_v14 = vrot.slane %v591_v11, 4 }
  0xda   : > { %v593_v19 = vadd.f32 %v592_v14, %v591_v11  ;;  %v562_v20 = vpop.permute.xlu1 %561 }
  0xdb   : > { %v570_v15 = vmul.f32 %v1088_v18, %v562_v20 }
  0xdc   : > { %v594_v23 = vrot.slane %v593_v19, 2 }
  0xdd   : > { %v599_v24 = vsel %vm459_vm1, %v570_v15, 0.0  ;;  %v884_v49 = vpop.eup %883 }
  0xde   : > { %v600_v26 = vadd.f32 %v599_v24, %v598_v21  ;;  %v595_v27 = vadd.f32 %v594_v23, %v593_v19 }
  0xe0   : > { %v601_v29 = vrot.slane %v600_v26, 4  ;;  %v596_v12 = vrot.slane %v595_v27, 1 }
  0xe2   : > { %v602_v31 = vadd.f32 %v601_v29, %v600_v26  ;;  %v597_v35 = vadd.f32 %v596_v12, %v595_v27 }
  0xe4   : > { %v603_v33 = vrot.slane %v602_v31, 2  ;;  %v612_v41 = vsel %vm502_vm3, %v597_v35, %v611_v38 }
  0xe6   : > { %v604_v18 = vadd.f32 %v603_v33, %v602_v31 }
  0xe8   : > { %v605_v37 = vrot.slane %v604_v18, 1 }
  0xea   : > { %v606_v39 = vadd.f32 %v605_v37, %v604_v18 }
  0xec   : > { %v613_v43 = vsel %vm504_vm4, %v606_v39, %v612_v41 }
  0xed   : > { %v615_v44 = vadd.f32 %v613_v43, %v510_v40 }
  0xef   : > { %616 = vst.msk [vmem:[#allocation2] sm:$0xf] %vm341_vm0, %v615_v44 }
  0xf6   : > { %v624_v47 = vld [vmem:[#allocation2] sm:$0xf] }
  0xf7   : > { %v625_v48 = vmul.f32 %v789_v46, %v624_v47 }
  0xf9   : > { %v626_v50 = vmul.f32 %v884_v49, %v625_v48 }
  0xfb   : > { %627 = vst.msk [vmem:[%s307_s15] sm:$0xf] %vm341_vm0, %v626_v50 }
  0xfc   : > { %912 = shalt.err (!%p909_p5)
}
  0xfd   : > { %796 = dma.vmem_to_hbm [thread:$0]  (%p1037_p4), %s643_s17, 64, %s645_s24, %s629_s21  }
  0xfe PF: > { %p802_p6 = scmp.ge.s32.totalorder %s963_s23, 2  ;;  %s656_s27 = sand.u32 1, %s943_s18  }
  0xff   : > { %s657_s10 = scalar_lea.sflag [#allocation5], %s656_s27 }
 0x100   : > { %p799_p7 = pnand %p802_p6, %p1044_p8 }
 0x102   : > { %p800_p9 = pneg %p799_p7 }
 0x104   : > { %938 = dma.done.wait (%p800_p9), %s657_s10, 64  }
 0x105   : > { %940 = vsyncadd (%p800_p9), %s657_s10, 4294967232  ;;  %s18_s23 = sadd.s32 1, %s963_s23   ;;  %s1165_s18 = smov %s947_s19 }
 0x106   : > { %p15_p10 = scmp.ge.s32.totalorder %s18_s23, 4   ;;  %s1166_s19 = smov %s951_s20 }
 0x107   : > { %s1167_s20 = smov %s1050_s6  ;;  %s1168_s21 = smov %s959_s22 }
 0x108   : > { %s1169_s22 = smov %s1171_s26  ;;  %17 = sbr.rel (!%p15_p10) target bundleno = 4 (0x4), region = 92 }
 0x10d   :  { %663 = vsyncpa [#allocation5], 1 }
 0x10e   :  { %665 = vsyncpa [#allocation5 + $0x1], 1 }

// kernel: rbf_forward.2
= control target key start
LH: loop header
LB: loop body
LE: loop exit
PB: predicated region body
PF: predicated region fallthrough
CT: control target
= control target key end

     0   :  { %s623_s18 = smov 0   ;;  %s768_s0 = inlined_call_operand.vmem [shape: f32[2,8,16], index: 0, kind: input, shape index: {}]   ;;  %s769_s1 = inlined_call_operand.vmem [shape: f32[128,8], index: 1, kind: input, shape index: {}]   ;;  %s770_s2 = inlined_call_operand.vmem [shape: f32[128,1], index: 2, kind: input, shape index: {}]   ;;  %s771_s3 = inlined_call_operand.vmem [shape: f32[4,128], index: 3, kind: input, shape index: {}]   ;;  %s772_s4 = inlined_call_operand.vmem [shape: f32[4,1], index: 4, kind: input, shape index: {}]   ;;  %s773_s5 = inlined_call_operand.vmem [shape: f32[2,4,16], index: 5, kind: output, shape index: {}]  }
   0x1 LB: > { %s545_s19 = sadd.s32 4294967295, %s590_s18   ;;  %p549_p0 = scmp.ge.s32.totalorder %s590_s18, 1  ;;  %s590_s18 = sphi %s623_s18, %s15_s18  }
   0x2   : > { %p186_p1 = scmp.lt.s32.totalorder %s590_s18, 3 }
   0x4   : > { %p187_p2 = pnand %p549_p0, %p186_p1 }
   0x5   : > { %p212_p3 = scmp.lt.s32.totalorder (!%p187_p2), %s545_s19, 1 }
   0x6   : > { %190 = sbr.rel (%p187_p2) target bundleno = 345 (0x159), region = 40 }
   0xb   : > { %v252_v0 = vld [vmem:[%s770_s2 + $0x78] sm:$0xff]  ;;  %v592_v1 = vmov 0   ;;  %v250_v2 = vld [vmem:[%s770_s2 + $0x68] sm:$0xff]  ;;  %s775_s19 = smov (!%p212_p3, %s545_s19), 1  ;;  %v221_v3 = vld [vmem:[%s769_s1] sm:$0xff]  ;;  %vm333_vm0 = vcmask 64512  }
   0xc   : > { %581 = vset.pattern.permute.xlu0 %v592_v1  ;;  %582 = vset.pattern.permute.xlu1 %v592_v1  ;;  %s550_s24 = sshll.u32 %s775_s19, 3  ;;  %v227_v5 = vld [vmem:[%s769_s1 + $0x30] sm:$0xff]  ;;  %v233_v6 = vld [vmem:[%s769_s1 + $0x60] sm:$0xff]  ;;  %v248_v9 = vld [vmem:[%s770_s2 + $0x58] sm:$0xff]  ;;  %s551_s23 = sshll.u32 %s775_s19, 2  ;;  %vm490_vm1 = vcmask 125952  }
   0xd   : > { %330 = vperm.xlu0 %581, %v252_v0   ;;  %320 = vperm.xlu1 %582, %v250_v2   ;;  %s215_s27 = scalar_lea.vmem %s768_s0, %s550_s24  ;;  %v251_v7 = vld [vmem:[%s770_s2 + $0x70] sm:$0xff]  ;;  %v249_v8 = vld [vmem:[%s770_s2 + $0x60] sm:$0xff]  ;;  %v222_v10 = vld [vmem:[%s769_s1 + $0x8] sm:$0xff]  ;;  %s219_s26 = scalar_lea.vmem %s773_s5, %s551_s23 }
   0xe   : > { %583 = vset.pattern.permute.xlu2 %v592_v1  ;;  %v220_v4 = vld [vmem:[%s215_s27] sm:$0xff]  ;;  %v228_v11 = vld [vmem:[%s769_s1 + $0x38] sm:$0xff]  ;;  %v234_v12 = vld [vmem:[%s769_s1 + $0x68] sm:$0xff] }
   0xf   : > { %397 = vmatpush.msra.mxu0 %v220_v4  ;;  %570 = vmatpush.msra.mxu2 %v220_v4  ;;  %v246_v13 = vld [vmem:[%s770_s2 + $0x48] sm:$0xff]  ;;  %v245_v14 = vld [vmem:[%s770_s2 + $0x40] sm:$0xff]  ;;  %v247_v15 = vld [vmem:[%s770_s2 + $0x50] sm:$0xff] }
  0x10   : > { %571 = vmatpush.msra.mxu3 %v220_v4  ;;  %552 = vmatmul.msk.f32.vlgmr.msra.gmra.mxu0 %vm333_vm0, %v221_v3  ;;  %v223_v16 = vld [vmem:[%s769_s1 + $0x10] sm:$0xff]  ;;  %v229_v17 = vld [vmem:[%s769_s1 + $0x40] sm:$0xff]  ;;  %v242_v20 = vld [vmem:[%s770_s2 + $0x28] sm:$0xff] }
  0x11   : > { %558 = vmatmul.msk.f32.vlgmr.msra.gmra.mxu2 %vm333_vm0, %v227_v5  ;;  %564 = vmatmul.msk.f32.vlgmr.msra.gmra.mxu3 %vm333_vm0, %v233_v6  ;;  %v235_v18 = vld [vmem:[%s769_s1 + $0x70] sm:$0xff]  ;;  %v244_v21 = vld [vmem:[%s770_s2 + $0x38] sm:$0xff]  ;;  %v230_v23 = vld [vmem:[%s769_s1 + $0x48] sm:$0xff] }
  0x12   : > { %310 = vperm.xlu2 %583, %v248_v9   ;;  %v243_v19 = vld [vmem:[%s770_s2 + $0x30] sm:$0xff]  ;;  %v224_v22 = vld [vmem:[%s769_s1 + $0x18] sm:$0xff]  ;;  %v241_v27 = vld [vmem:[%s770_s2 + $0x20] sm:$0xff] }
  0x13   : > { %v236_v24 = vld [vmem:[%s769_s1 + $0x78] sm:$0xff]  ;;  %v239_v26 = vld [vmem:[%s770_s2 + $0x10] sm:$0xff]  ;;  %v225_v28 = vld [vmem:[%s769_s1 + $0x20] sm:$0xff] }
  0x14   : > { %v240_v25 = vld [vmem:[%s770_s2 + $0x18] sm:$0xff]  ;;  %v231_v29 = vld [vmem:[%s769_s1 + $0x50] sm:$0xff]  ;;  %v237_v30 = vld [vmem:[%s770_s2] sm:$0xff] }
  0x15   : > { %325 = vperm.xlu0 %581, %v251_v7   ;;  %315 = vperm.xlu1 %582, %v249_v8   ;;  %v464_v31 = vld [vmem:[%s772_s4] sm:$0xf]  ;;  %v238_v32 = vld [vmem:[%s770_s2 + $0x8] sm:$0xff]  ;;  %v232_v34 = vld [vmem:[%s769_s1 + $0x58] sm:$0xff] }
  0x16   : > { %v226_v33 = vld [vmem:[%s769_s1 + $0x28] sm:$0xff] }
  0x18   : > { %553 = vmatmul.msk.f32.gmra.mxu0 %vm333_vm0, %v222_v10 }
  0x19   : > { %559 = vmatmul.msk.f32.gmra.mxu2 %vm333_vm0, %v228_v11  ;;  %565 = vmatmul.msk.f32.gmra.mxu3 %vm333_vm0, %v234_v12 }
  0x1a   : > { %305 = vperm.xlu2 %583, %v247_v15  }
  0x1d   : > { %300 = vperm.xlu0 %581, %v246_v13   ;;  %295 = vperm.xlu1 %582, %v245_v14  }
  0x20   : > { %554 = vmatmul.msk.f32.gmra.mxu0 %vm333_vm0, %v223_v16 }
  0x21   : > { %560 = vmatmul.msk.f32.gmra.mxu2 %vm333_vm0, %v229_v17  ;;  %566 = vmatmul.msk.f32.gmra.mxu3 %vm333_vm0, %v235_v18 }
  0x22   : > { %290 = vperm.xlu2 %583, %v244_v21  }
  0x25   : > { %285 = vperm.xlu0 %581, %v243_v19   ;;  %280 = vperm.xlu1 %582, %v242_v20  }
  0x28   : > { %555 = vmatmul.msk.f32.gmra.mxu0 %vm333_vm0, %v224_v22 }
  0x29   : > { %561 = vmatmul.msk.f32.gmra.mxu2 %vm333_vm0, %v230_v23  ;;  %567 = vmatmul.msk.f32.gmra.mxu3 %vm333_vm0, %v236_v24 }
  0x2a   : > { %275 = vperm.xlu2 %583, %v241_v27  }
  0x2d   : > { %270 = vperm.xlu0 %581, %v240_v25   ;;  %265 = vperm.xlu1 %582, %v239_v26  }
  0x30   : > { %556 = vmatmul.msk.f32.gmra.mxu0 %vm333_vm0, %v225_v28 }
  0x31   : > { %562 = vmatmul.msk.f32.gmra.mxu2 %vm333_vm0, %v231_v29 }
  0x32   : > { %260 = vperm.xlu2 %583, %v238_v32  }
  0x35   : > { %255 = vperm.xlu0 %581, %v237_v30   ;;  %467 = vperm.xlu1 %582, %v464_v31  }
  0x38   : > { %557 = vmatmul.msk.f32.gmra.mxu0 %vm333_vm0, %v226_v33 }
  0x39   : > { %563 = vmatmul.msk.f32.gmra.mxu2 %vm333_vm0, %v232_v34 }
  0x6c   : > { %v311_v43 = vpop.permute.xlu2 %310 }
  0x74   : > { %v306_v53 = vpop.permute.xlu2 %305 }
  0x7c   : > { %v291_v0 = vpop.permute.xlu2 %290 }
  0x7f   : > { %v331_v38 = vpop.permute.xlu0 %330  ;;  %v321_v42 = vpop.permute.xlu1 %320 }
  0x84   : > { %v276_v11 = vpop.permute.xlu2 %275 }
  0x87   : > { %v326_v46 = vpop.permute.xlu0 %325  ;;  %v316_v52 = vpop.permute.xlu1 %315 }
  0x8c   : > { %v261_v25 = vpop.permute.xlu2 %260 }
  0x8d   : > { %v752_v35 = vpop.f32.mrf.mxu0 }
  0x8f   : > { %v301_v56 = vpop.permute.xlu0 %300  ;;  %v296_v63 = vpop.permute.xlu1 %295 }
  0x94   : > { %v417_v36 = vpop.f32.mrf.mxu2  ;;  %v435_v37 = vpop.f32.mrf.mxu3 }
  0x95   : > { %v754_v39 = vpop.f32.mrf.mxu0  ;;  %v436_v58 = vadd.f32 %v435_v37, %v316_v52 }
  0x96   : > { %v403_v30 = vadd.f32 %v754_v39, %v261_v25 }
  0x97   : > { %v459_v62 = vmax.f32 %v436_v58, 0.0  ;;  %v286_v1 = vpop.permute.xlu0 %285  ;;  %v281_v10 = vpop.permute.xlu1 %280 }
  0x98   : > { %v418_v16 = vadd.f32 %v417_v36, %v286_v1  ;;  %v448_v33 = vmax.f32 %v403_v30, 0.0  ;;  %v463_v36 = vld [vmem:[%s771_s3] sm:$0xf] }
  0x9a   : > { %v453_v20 = vmax.f32 %v418_v16, 0.0 }
  0x9c   : > { %v420_v40 = vpop.f32.mrf.mxu2  ;;  %v438_v41 = vpop.f32.mrf.mxu3 }
  0x9d   : > { %v405_v47 = vpop.f32.mrf.mxu0  ;;  %v439_v54 = vadd.f32 %v438_v41, %v321_v42  ;;  %v421_v12 = vadd.f32 %v420_v40, %v291_v0 }
  0x9f   : > { %v460_v60 = vmax.f32 %v439_v54, 0.0  ;;  %v271_v14 = vpop.permute.xlu0 %270  ;;  %v454_v18 = vmax.f32 %v421_v12, 0.0  ;;  %v266_v24 = vpop.permute.xlu1 %265 }
  0xa0   : > { %v406_v26 = vadd.f32 %v405_v47, %v266_v24 }
  0xa2   : > { %v449_v32 = vmax.f32 %v406_v26, 0.0 }
  0xa4   : > { %v423_v44 = vpop.f32.mrf.mxu2  ;;  %v441_v45 = vpop.f32.mrf.mxu3 }
  0xa5   : > { %v442_v50 = vadd.f32 %v441_v45, %v326_v46  ;;  %v408_v57 = vpop.f32.mrf.mxu0  ;;  %v424_v8 = vadd.f32 %v423_v44, %v296_v63 }
  0xa6   : > { %v409_v22 = vadd.f32 %v408_v57, %v271_v14 }
  0xa7   : > { %v461_v59 = vmax.f32 %v442_v50, 0.0  ;;  %v455_v17 = vmax.f32 %v424_v8, 0.0  ;;  %v256_v28 = vpop.permute.xlu0 %255  ;;  %v468_v37 = vpop.permute.xlu1 %467 }
  0xa8   : > { %v450_v29 = vmax.f32 %v409_v22, 0.0  ;;  %v400_v31 = vadd.f32 %v752_v35, %v256_v28 }
  0xaa   : > { %v447_v34 = vmax.f32 %v400_v31, 0.0 }
  0xac   : > { %v426_v48 = vpop.f32.mrf.mxu2  ;;  %v444_v49 = vpop.f32.mrf.mxu3 }
  0xad   : > { %v445_v51 = vadd.f32 %v444_v49, %v331_v38  ;;  %v411_v2 = vpop.f32.mrf.mxu0  ;;  %v427_v6 = vadd.f32 %v426_v48, %v301_v56 }
  0xae   : > { %v412_v21 = vadd.f32 %v411_v2, %v276_v11 }
  0xaf   : > { %v462_v55 = vmax.f32 %v445_v51, 0.0  ;;  %v456_v13 = vmax.f32 %v427_v6, 0.0 }
  0xb0   : > { %v451_v27 = vmax.f32 %v412_v21, 0.0 }
  0xb1   : > { %470 = vmatpush.msra.mxu1 %v462_v55 }
  0xb3   : > { %471 = vmatpush.msra.mxu1 %v461_v59 }
  0xb4   : > { %v429_v61 = vpop.f32.mrf.mxu2 }
  0xb5   : > { %472 = vmatpush.msra.mxu1 %v460_v60  ;;  %v430_v4 = vadd.f32 %v429_v61, %v306_v53  ;;  %v414_v15 = vpop.f32.mrf.mxu0 }
  0xb6   : > { %v415_v19 = vadd.f32 %v414_v15, %v281_v10 }
  0xb7   : > { %473 = vmatpush.msra.mxu1 %v459_v62  ;;  %v457_v9 = vmax.f32 %v430_v4, 0.0 }
  0xb8   : > { %v452_v23 = vmax.f32 %v415_v19, 0.0 }
  0xbc   : > { %v432_v3 = vpop.f32.mrf.mxu2 }
  0xbd   : > { %v433_v5 = vadd.f32 %v432_v3, %v311_v43 }
  0xbf   : > { %v458_v7 = vmax.f32 %v433_v5, 0.0 }
  0xc1   : > { %474 = vmatpush.msra.mxu1 %v458_v7 }
  0xc3   : > { %475 = vmatpush.msra.mxu1 %v457_v9 }
  0xc5   : > { %476 = vmatpush.msra.mxu1 %v456_v13 }
  0xc7   : > { %477 = vmatpush.msra.mxu1 %v455_v17 }
  0xc9   : > { %478 = vmatpush.msra.mxu1 %v454_v18 }
  0xcb   : > { %479 = vmatpush.msra.mxu1 %v453_v20 }
  0xcd   : > { %480 = vmatpush.msra.mxu1 %v452_v23 }
  0xcf   : > { %481 = vmatpush.msra.mxu1 %v451_v27 }
  0xd1   : > { %482 = vmatpush.msra.mxu1 %v450_v29 }
  0xd3   : > { %483 = vmatpush.msra.mxu1 %v449_v32 }
  0xd5   : > { %484 = vmatpush.msra.mxu1 %v448_v33 }
  0xd7   : > { %485 = vmatpush.msra.mxu1 %v447_v34 }
  0xd8   : > { %486 = vmatmul.f32.vlgmr.msra.gmra.mxu1 %v463_v36 }
 0x155   : > { %v487_v38 = vpop.f32.mrf.mxu1 }
 0x156   : > { %v488_v35 = vadd.f32 %v487_v38, %v468_v37 }
 0x158   : > { %491 = vst.msk [vmem:[%s219_s26] sm:$0xf] %vm490_vm1, %v488_v35 }
 0x159 PF: > { %s15_s18 = sadd.s32 1, %s590_s18  }
 0x15a   : > { %p12_p4 = scmp.ge.s32.totalorder %s15_s18, 4  }
 0x15c   :  { %14 = sbr.rel (!%p12_p4) target bundleno = 1 (0x1), region = 70 }

</bundles_post_ra>
